<compile_context>
chip_gen: v5e
topology: v5e:2x2
jax: 0.10.0
libtpu: 0.0.40
codegen_flags: <defaults>
</compile_context>

<pallas_src>
import functools
from typing import NamedTuple

import jax
import jax.numpy as jnp
from jax.experimental import pallas as pl
from jax.experimental.pallas import tpu as pltpu

LANES = 128
SUBLANES = 8


def _cdiv(a, b):
    return (a + b - 1) // b


def _round_up(a, b):
    return _cdiv(a, b) * b


def _ceil_log2(x):
    x = int(x)
    return (x - 1).bit_length() if x > 1 else 0


class BucketScatterBuffers(NamedTuple):
    gather_index: jax.Array   # (pad_to,)  source point index per output slot, -1 = padding
    point_slot: jax.Array     # (N,)       output slot per input point, -1 = dropped (overflow)
    bucket_counts: jax.Array  # (n_buckets,) kept points per bucket (<= bucket_size)
    bucket_ids: jax.Array     # (N,)       bucket id per input point
    hashes: jax.Array         # (N,)       spatial hash per input point


# --------------------------------------------------------------------------
# Kernel: per-point spatial hash + bucket id (+ optional packed sort key).
# coords laid out (3, n_rows, 128): point i lives at (row=i//128, lane=i%128),
# so every vreg is fully occupied (8 sublanes x 128 lanes).
# --------------------------------------------------------------------------
def _hash_bucket_kernel(seps_ref, coords_ref, key_ref, hash_ref,
                        *, n_valid, n_buckets, hash_op, n_seps,
                        idx_bits, pack_key):
    t = pl.program_id(0)
    rb, lanes = key_ref.shape                         # (rows_per_block, 128)

    row = jax.lax.broadcasted_iota(jnp.int32, (rb, lanes), 0)
    lane = jax.lax.broadcasted_iota(jnp.int32, (rb, lanes), 1)
    idx = (t * rb + row) * lanes + lane               # global point index

    x = coords_ref[0]                                 # (rb, 128) int32
    y = coords_ref[1]
    z = coords_ref[2]

    # ---- batch id = number of cumulative segment ends <= point index.
    # Scalar SMEM reads are hoisted out of control flow; when the whole tile
    # falls inside one segment (common case), broadcast a constant batch and
    # skip the per-element compares entirely.
    sep_vals = [seps_ref[b] for b in range(n_seps)]
    block_pts = rb * lanes
    first_idx = t * block_pts
    last_idx = first_idx + (block_pts - 1)

    def scalar_batch(i):
        b = jnp.int32(0)
        for s in sep_vals:
            b = b + (i >= s).astype(jnp.int32)
        return b

    def uniform_batch():
        return jnp.full((rb, lanes), scalar_batch(first_idx), jnp.int32)

    def per_element_batch():
        batch = jnp.zeros((rb, lanes), jnp.int32)
        for s in sep_vals:
            batch = batch + (idx >= s)                # accumulate bool directly
        return batch

    if n_seps == 0:
        batch = jnp.zeros((rb, lanes), jnp.int32)
    elif n_seps == 1:
        batch = per_element_batch()
    else:
        b_first = scalar_batch(first_idx)
        b_last = scalar_batch(last_idx)
        batch = jax.lax.cond(b_first == b_last, uniform_batch, per_element_batch)

    # ---- spatial hash (hash_op is a trace-time Python int -> one variant only).
    if hash_op == 0:
        h = ((x * jnp.int32(73856093))
             ^ (y * jnp.int32(19349663))
             ^ (z * jnp.int32(83492791)))
    else:
        h = ((x * jnp.int32(1000003)) + y) * jnp.int32(1000003) + z
    h = h & jnp.int32(0x7FFFFFFF)
    # mix batch id so different batch segments spread over different buckets
    h = (h ^ (batch * jnp.int32(40503))) & jnp.int32(0x7FFFFFFF)

    if n_buckets & (n_buckets - 1) == 0:
        # power-of-two bucket count: cheap mask instead of integer modulo
        bucket = h & jnp.int32(n_buckets - 1)
    else:
        # TODO(synk): magic-number multiply+shift for constant modulo; rem is the
        #             slow VPU fallback for non-power-of-two bucket counts.
        bucket = jax.lax.rem(h, jnp.int32(n_buckets))

    valid = idx < n_valid
    bucket = jnp.where(valid, bucket, jnp.int32(n_buckets))   # sentinel for padding

    if pack_key:
        # packed sort key: (bucket, idx) lexicographic in one int32; sorting it
        # gives a stable argsort-by-bucket for free (shl/or are VPU filler
        # hidden under the DMA slack of this memory-bound kernel).
        key_ref[...] = (bucket << idx_bits) | idx
    else:
        key_ref[...] = bucket
    hash_ref[...] = jnp.where(valid, h, jnp.int32(0x7FFFFFFF))


# --------------------------------------------------------------------------
# Wrapper
# --------------------------------------------------------------------------
def psh_scatter(coords, seps, hash_op, bucket_size=512):
    n, c_dim = coords.shape
    assert c_dim == 3, "coords must be (N, 3)"
    pad_to = _cdiv(n, bucket_size) * bucket_size
    n_buckets = pad_to // bucket_size

    # ---- tiling: rb sublane rows x 128 lanes per grid step.
    # rb up to 1024 (~2.5 MiB/step, ~5 MiB double-buffered VMEM) keeps the
    # kernel HBM-bound rather than per-step-overhead-bound on v5e/v6e/v7x.
    n_rows_min = _round_up(max(_cdiv(max(pad_to, n), LANES), SUBLANES), SUBLANES)
    RB_CAP = 1024
    rb = min(RB_CAP, n_rows_min)
    grid_len = _cdiv(n_rows_min, rb)
    if grid_len == 1 and rb > SUBLANES:
        # split into >= 2 blocks so v7x's two TensorCores both get work
        rb = _round_up(_cdiv(rb, 2), SUBLANES)
        grid_len = _cdiv(n_rows_min, rb)
    if grid_len > 1 and grid_len % 2 == 1:
        grid_len += 1                      # even grid -> balanced megacore split
    n_rows = grid_len * rb
    n_pad = n_rows * LANES

    # ---- single pad + transpose (no redundant padded-buffer double write).
    # TODO(synk): accepting coords in SoA (3, N) layout upstream would remove
    #             this transpose entirely.
    coords = coords.astype(jnp.int32)
    coords_t = jnp.pad(coords, ((0, n_pad - n), (0, 0))).T.reshape(3, n_rows, LANES)

    seps_arr = jnp.asarray(seps, jnp.int32).reshape(-1)

    # ---- packed single-key sort feasibility.
    idx_bits = _ceil_log2(n_pad)
    bucket_bits = _ceil_log2(n_buckets + 1)            # + sentinel bucket
    pack_key = (idx_bits + bucket_bits) <= 31

    kernel = functools.partial(
        _hash_bucket_kernel,
        n_valid=n, n_buckets=n_buckets,
        hash_op=int(hash_op), n_seps=int(seps_arr.shape[0]),
        idx_bits=idx_bits, pack_key=pack_key)

    # NOTE: if the grid is short and xprof shows exposed DMA ramp, add
    # pipeline_mode=pl.Buffered(3) on the coords BlockSpec (low priority).
    key_2d, hash_2d = pl.pallas_call(
        kernel,
        out_shape=(jax.ShapeDtypeStruct((n_rows, LANES), jnp.int32),
                   jax.ShapeDtypeStruct((n_rows, LANES), jnp.int32)),
        grid_spec=pltpu.PrefetchScalarGridSpec(
            num_scalar_prefetch=1,                       # seps -> SMEM
            grid=(grid_len,),
            in_specs=[pl.BlockSpec((3, rb, LANES), lambda i, seps: (0, i, 0))],
            out_specs=(pl.BlockSpec((rb, LANES), lambda i, seps: (i, 0)),
                       pl.BlockSpec((rb, LANES), lambda i, seps: (i, 0))),
        ),
        compiler_params=pltpu.CompilerParams(dimension_semantics=("parallel",)),
    )(seps_arr, coords_t)

    key_flat = key_2d.reshape(-1)           # (n_pad,)
    hashes = hash_2d.reshape(-1)            # (n_pad,)

    # ---- glue: stable ordering by bucket + capacity clip.
    # TODO(synk): no clean Pallas-TPU sort primitive; the sort stays in XLA.
    if pack_key:
        idx_mask = jnp.int32((1 << idx_bits) - 1)
        bucket_ids = key_flat >> idx_bits                    # 0..n_buckets (sentinel)
        key_sorted = jnp.sort(key_flat)                      # single int32 key
        perm = (key_sorted & idx_mask).astype(jnp.int32)     # stable by construction
        sorted_bucket = key_sorted >> idx_bits
    else:
        bucket_ids = key_flat
        perm = jnp.argsort(bucket_ids).astype(jnp.int32)     # stable
        sorted_bucket = bucket_ids[perm]

    counts_all = jnp.bincount(bucket_ids, length=n_buckets + 1)
    starts = (jnp.cumsum(counts_all) - counts_all).astype(jnp.int32)   # exclusive cumsum
    rank = jnp.arange(n_pad, dtype=jnp.int32) - starts[sorted_bucket]
    kept = (sorted_bucket < n_buckets) & (rank < bucket_size)
    dest = jnp.where(kept, sorted_bucket * bucket_size + rank, pad_to)  # pad_to == dropped

    gather_index = jnp.full((pad_to,), -1, jnp.int32).at[dest].set(perm, mode="drop")
    point_slot = jnp.full((n_pad,), -1, jnp.int32).at[perm].set(
        jnp.where(kept, dest, -1).astype(jnp.int32))[:n]
    bucket_counts = jnp.minimum(counts_all[:n_buckets], bucket_size).astype(jnp.int32)

    # ---- payload move: plain XLA gather (12-byte rows).
    idx_src = jnp.maximum(gather_index, 0)
    valid = gather_index >= 0
    scattered_coord = jnp.where(valid[:, None], coords[idx_src], jnp.int32(-1))  # (pad_to, 3)

    buffers = BucketScatterBuffers(
        gather_index=gather_index,
        point_slot=point_slot,
        bucket_counts=bucket_counts,
        bucket_ids=bucket_ids[:n],
        hashes=hashes[:n],
    )
    return scattered_coord, buffers


class PSHScatterLayer:
    """JAX/Pallas equivalent of the PyTorch PSHScatterLayer (no parameters)."""

    def __init__(self, bucket_size: int = 512) -> None:
        self.bucket_size = bucket_size

    def __call__(self, coords, seps, hash_op):
        return psh_scatter(coords, seps, hash_op, self.bucket_size)


if __name__ == "__main__":
    key = jax.random.PRNGKey(0)
    n_points, bucket_size = 50, 8
    coords = jax.random.randint(key, (n_points, 3), 0, 16, dtype=jnp.int32)
    seps = jnp.asarray([24, n_points], jnp.int32)   # cumulative segment ends per batch

    layer = PSHScatterLayer(bucket_size=bucket_size)
    scattered, bufs = layer(coords, seps, hash_op=0)
    jax.block_until_ready((scattered, bufs))

    pad_to = _cdiv(n_points, bucket_size) * bucket_size
    n_buckets = pad_to // bucket_size
    assert scattered.shape == (pad_to, 3)
    assert bufs.gather_index.shape == (pad_to,)
    assert bufs.point_slot.shape == (n_points,)
    assert bufs.bucket_counts.shape == (n_buckets,)
    assert bufs.bucket_ids.shape == (n_points,)
    assert bufs.hashes.shape == (n_points,)
    # sanity: every occupied slot points back at a real input point and carries its coords
    gi = bufs.gather_index
    occupied = gi >= 0
    assert bool(jnp.all(jnp.where(occupied, (gi >= 0) & (gi < n_points), True)))
    src = jnp.maximum(gi, 0)
    assert bool(jnp.all(jnp.where(occupied[:, None], scattered == coords[src], scattered == -1)))
    assert int(bufs.bucket_counts.sum()) == int(occupied.sum())
    # sanity: every bucket id is in range and bucket counts never exceed capacity
    assert bool(jnp.all((bufs.bucket_ids >= 0) & (bufs.bucket_ids < n_buckets)))
    assert bool(jnp.all(bufs.bucket_counts <= bucket_size))
    print("KERNEL_OK")
</pallas_src>

<mosaic_0001>
module attributes {stable_mosaic.version = 11 : i64} {
  func.func @_hash_bucket_kernel(%arg0: i32, %arg1: memref<2xi32, #tpu.memory_space<smem>>, %arg2: memref<3x8x128xi32, #tpu.memory_space<vmem>>, %arg3: memref<8x128xi32, #tpu.memory_space<vmem>>, %arg4: memref<8x128xi32, #tpu.memory_space<vmem>>) attributes {dimension_semantics = [#tpu.dimension_semantics<parallel>], iteration_bounds = array<i64: 1>, scalar_prefetch = 1 : i64, scratch_operands = 0 : i64, tpu.core_type = #tpu.core_type<tc>, window_params = [{transform_indices = @transform_0, window_bounds = array<i64: 3, 8, 128>}, {transform_indices = @transform_1, window_bounds = array<i64: 8, 128>}, {transform_indices = @transform_2, window_bounds = array<i64: 8, 128>}]} {
    %0 = tpu.iota {dimensions = array<i32: 0>} : vector<8x128xi32>
    %1 = tpu.iota {dimensions = array<i32: 1>} : vector<8x128xi32>
    %c8_i32 = arith.constant 8 : i32
    %2 = arith.muli %arg0, %c8_i32 : i32
    %3 = vector.broadcast %2 : i32 to vector<8x128xi32>
    %4 = arith.addi %3, %0 : vector<8x128xi32>
    %c128_i32 = arith.constant 128 : i32
    %5 = vector.broadcast %c128_i32 : i32 to vector<8x128xi32>
    %6 = arith.muli %4, %5 : vector<8x128xi32>
    %7 = arith.addi %6, %1 : vector<8x128xi32>
    %c0 = arith.constant 0 : index
    %c0_0 = arith.constant 0 : index
    %c0_1 = arith.constant 0 : index
    %8 = vector.load %arg2[%c0, %c0_0, %c0_1] : memref<3x8x128xi32, #tpu.memory_space<vmem>>, vector<1x8x128xi32>
    %9 = vector.shape_cast %8 : vector<1x8x128xi32> to vector<8x128xi32>
    %c1 = arith.constant 1 : index
    %c0_2 = arith.constant 0 : index
    %c0_3 = arith.constant 0 : index
    %10 = vector.load %arg2[%c1, %c0_2, %c0_3] : memref<3x8x128xi32, #tpu.memory_space<vmem>>, vector<1x8x128xi32>
    %11 = vector.shape_cast %10 : vector<1x8x128xi32> to vector<8x128xi32>
    %c2 = arith.constant 2 : index
    %c0_4 = arith.constant 0 : index
    %c0_5 = arith.constant 0 : index
    %12 = vector.load %arg2[%c2, %c0_4, %c0_5] : memref<3x8x128xi32, #tpu.memory_space<vmem>>, vector<1x8x128xi32>
    %13 = vector.shape_cast %12 : vector<1x8x128xi32> to vector<8x128xi32>
    %c0_6 = arith.constant 0 : index
    %14 = memref.load %arg1[%c0_6] : memref<2xi32, #tpu.memory_space<smem>>
    %c1_7 = arith.constant 1 : index
    %15 = memref.load %arg1[%c1_7] : memref<2xi32, #tpu.memory_space<smem>>
    %c1024_i32 = arith.constant 1024 : i32
    %16 = arith.muli %arg0, %c1024_i32 : i32
    %c1023_i32 = arith.constant 1023 : i32
    %17 = arith.addi %16, %c1023_i32 : i32
    %18 = arith.cmpi sge, %16, %14 : i32
    %19 = arith.extui %18 : i1 to i32
    %c0_i32 = arith.constant 0 : i32
    %20 = arith.addi %c0_i32, %19 : i32
    %21 = arith.cmpi sge, %16, %15 : i32
    %22 = arith.extui %21 : i1 to i32
    %23 = arith.addi %20, %22 : i32
    %24 = arith.cmpi sge, %17, %14 : i32
    %25 = arith.extui %24 : i1 to i32
    %c0_i32_8 = arith.constant 0 : i32
    %26 = arith.addi %c0_i32_8, %25 : i32
    %27 = arith.cmpi sge, %17, %15 : i32
    %28 = arith.extui %27 : i1 to i32
    %29 = arith.addi %26, %28 : i32
    %30 = arith.cmpi eq, %23, %29 : i32
    %31 = arith.extui %30 : i1 to i32
    %c0_i32_9 = arith.constant 0 : i32
    %32 = arith.cmpi ne, %31, %c0_i32_9 : i32
    %33 = scf.if %32 -> (vector<8x128xi32>) {
      %62 = arith.cmpi sge, %16, %14 : i32
      %63 = arith.extui %62 : i1 to i32
      %c0_i32_17 = arith.constant 0 : i32
      %64 = arith.addi %c0_i32_17, %63 : i32
      %65 = arith.cmpi sge, %16, %15 : i32
      %66 = arith.extui %65 : i1 to i32
      %67 = arith.addi %64, %66 : i32
      %68 = vector.broadcast %67 : i32 to vector<8x128xi32>
      scf.yield %68 : vector<8x128xi32>
    } else {
      %c0_i32_17 = arith.constant 0 : i32
      %62 = vector.broadcast %c0_i32_17 : i32 to vector<8x128xi32>
      %63 = vector.broadcast %14 : i32 to vector<8x128xi32>
      %64 = arith.cmpi sge, %7, %63 : vector<8x128xi32>
      %65 = arith.extui %64 : vector<8x128xi1> to vector<8x128xi32>
      %66 = arith.addi %62, %65 : vector<8x128xi32>
      %67 = vector.broadcast %15 : i32 to vector<8x128xi32>
      %68 = arith.cmpi sge, %7, %67 : vector<8x128xi32>
      %69 = arith.extui %68 : vector<8x128xi1> to vector<8x128xi32>
      %70 = arith.addi %66, %69 : vector<8x128xi32>
      scf.yield %70 : vector<8x128xi32>
    }
    %c73856093_i32 = arith.constant 73856093 : i32
    %34 = vector.broadcast %c73856093_i32 : i32 to vector<8x128xi32>
    %35 = arith.muli %9, %34 : vector<8x128xi32>
    %c19349663_i32 = arith.constant 19349663 : i32
    %36 = vector.broadcast %c19349663_i32 : i32 to vector<8x128xi32>
    %37 = arith.muli %11, %36 : vector<8x128xi32>
    %38 = arith.xori %35, %37 : vector<8x128xi32>
    %c83492791_i32 = arith.constant 83492791 : i32
    %39 = vector.broadcast %c83492791_i32 : i32 to vector<8x128xi32>
    %40 = arith.muli %13, %39 : vector<8x128xi32>
    %41 = arith.xori %38, %40 : vector<8x128xi32>
    %c2147483647_i32 = arith.constant 2147483647 : i32
    %42 = vector.broadcast %c2147483647_i32 : i32 to vector<8x128xi32>
    %43 = arith.andi %41, %42 : vector<8x128xi32>
    %c40503_i32 = arith.constant 40503 : i32
    %44 = vector.broadcast %c40503_i32 : i32 to vector<8x128xi32>
    %45 = arith.muli %33, %44 : vector<8x128xi32>
    %46 = arith.xori %43, %45 : vector<8x128xi32>
    %c2147483647_i32_10 = arith.constant 2147483647 : i32
    %47 = vector.broadcast %c2147483647_i32_10 : i32 to vector<8x128xi32>
    %48 = arith.andi %46, %47 : vector<8x128xi32>
    %c7_i32 = arith.constant 7 : i32
    %49 = vector.broadcast %c7_i32 : i32 to vector<8x128xi32>
    %50 = arith.remsi %48, %49 : vector<8x128xi32>
    %c50_i32 = arith.constant 50 : i32
    %51 = vector.broadcast %c50_i32 : i32 to vector<8x128xi32>
    %52 = arith.cmpi slt, %7, %51 : vector<8x128xi32>
    %c7_i32_11 = arith.constant 7 : i32
    %53 = vector.broadcast %c7_i32_11 : i32 to vector<8x128xi32>
    %54 = arith.select %52, %50, %53 : vector<8x128xi1>, vector<8x128xi32>
    %c10_i32 = arith.constant 10 : i32
    %55 = vector.broadcast %c10_i32 : i32 to vector<8x128xi32>
    %56 = arith.shli %54, %55 : vector<8x128xi32>
    %57 = arith.ori %56, %7 : vector<8x128xi32>
    %c0_12 = arith.constant 0 : index
    %c0_13 = arith.constant 0 : index
    %58 = vector.load %arg3[%c0_12, %c0_13] : memref<8x128xi32, #tpu.memory_space<vmem>>, vector<8x128xi32>
    tpu.vector_store %arg3[%c0_12, %c0_13], %57 {strides = array<i32>} : memref<8x128xi32, #tpu.memory_space<vmem>>, vector<8x128xi32>,
    %c2147483647_i32_14 = arith.constant 2147483647 : i32
    %59 = vector.broadcast %c2147483647_i32_14 : i32 to vector<8x128xi32>
    %60 = arith.select %52, %48, %59 : vector<8x128xi1>, vector<8x128xi32>
    %c0_15 = arith.constant 0 : index
    %c0_16 = arith.constant 0 : index
    %61 = vector.load %arg4[%c0_15, %c0_16] : memref<8x128xi32, #tpu.memory_space<vmem>>, vector<8x128xi32>
    tpu.vector_store %arg4[%c0_15, %c0_16], %60 {strides = array<i32>} : memref<8x128xi32, #tpu.memory_space<vmem>>, vector<8x128xi32>,
    return
  }
  func.func @transform_0(%arg0: i32, %arg1: memref<2xi32, #tpu.memory_space<smem>>) -> (i32, i32, i32) {
    %c0_i32 = arith.constant 0 : i32
    %c0_i32_0 = arith.constant 0 : i32
    %c0_i32_1 = arith.constant 0 : i32
    return %c0_i32, %arg0, %c0_i32_0 : i32, i32, i32
  }
  func.func @transform_1(%arg0: i32, %arg1: memref<2xi32, #tpu.memory_space<smem>>) -> (i32, i32) {
    %c0_i32 = arith.constant 0 : i32
    %c0_i32_0 = arith.constant 0 : i32
    return %arg0, %c0_i32 : i32, i32
  }
  func.func @transform_2(%arg0: i32, %arg1: memref<2xi32, #tpu.memory_space<smem>>) -> (i32, i32) {
    %c0_i32 = arith.constant 0 : i32
    %c0_i32_0 = arith.constant 0 : i32
    return %arg0, %c0_i32 : i32, i32
  }
}

</mosaic_0001>

<bundles_post_ra>
// kernel: tpu_custom_call.1
= control target key start
LH: loop header
LB: loop body
LE: loop exit
PB: predicated region body
PF: predicated region fallthrough
CT: control target
= control target key end

     0   :  { %s277_s15 = smov [#allocation3]   ;;  %s326_s0 = inlined_call_operand.hbm [shape: s32[2], index: 0, kind: input, shape index: {}]   ;;  %s327_s1 = inlined_call_operand.hbm [shape: s32[3,8,128], index: 1, kind: input, shape index: {}]   ;;  %s328_s2 = inlined_call_operand.hbm [shape: s32[8,128], index: 2, kind: output, shape index: {0}]   ;;  %s329_s3 = inlined_call_operand.hbm [shape: s32[8,128], index: 3, kind: output, shape index: {1}]  }
   0x1   :  { %s10_s14 = sshll.u32 %s326_s0, 4  ;;  %s11_s14 = int_to_ptr.hbm [resolvable:$true] %s10_s14 }
   0x2   :  { %13 = dma.hbm_to_smem %s11_s14, 16, %s277_s15, [#allocation2] }
   0x3   :  { %269 = dma.done.wait [#allocation2], 16 }
   0x4   :  { %270 = vsyncadd [#allocation2], 4294967280 }
   0x5   :  { %16 = sfence }
   0x6   :  { %17 = vsyncpa [#allocation5], 0 }
   0x7   :  { %18 = vsyncpa [#allocation6], 0 }
   0x8   :  { %19 = vsyncpa [#allocation9], 0  ;;  %s24_s18 = sshll.u32 %s327_s1, 4  ;;  %s278_s19 = smov [#allocation4]   ;;  %s25_s18 = int_to_ptr.hbm [resolvable:$true] %s24_s18 }
   0x9   :  { %s26_s20 = sshll.u32 %s278_s19, 4  ;;  %s279_s21 = smov 128   ;;  %s27_s20 = int_to_ptr.vmem [resolvable:$true] %s26_s20 }
   0xa   :  { %s280_s22 = smov 8  }
   0xb   :  { %32 = dma.hbm_to_vmem [thread:$0]  %s25_s18, 384, %s27_s20, [#allocation5], %s279_s21, %s279_s21, %s280_s22  }
   0xc   :  { %271 = dma.done.wait [#allocation5], 384  }
   0xd   :  { %272 = vsyncadd [#allocation5], 4294966912  ;;  %v37_v0 = vlaneseq  ;;  %s51_s0 = sld [smem:[#allocation3]]  ;;  %v46_v4 = vld [vmem:[#allocation4] sm:$0xff]  ;;  %v48_v5 = vld [vmem:[#allocation4 + $0x8] sm:$0xff]  ;;  %v281_v14 = vmov 0  }
   0xe   :  { %s160_s23 = sld [smem:[#allocation3 + $0x1]]  ;;  %v82_v9 = vmul.u32 73856093, %v46_v4  ;;  %v83_v10 = vmul.u32 19349663, %v48_v5  ;;  %v50_v11 = vld [vmem:[#allocation4 + $0x10] sm:$0xff] }
   0xf   :  { %v38_v1 = vshrl.u32 %v37_v0, 7  ;;  %v40_v2 = vand.u32 127, %v37_v0  ;;  %v85_v13 = vmul.u32 83492791, %v50_v11  ;;  %s282_s4 = smov [#allocation8]   ;;  %s145_s8 = sshll.u32 %s329_s3, 4  ;;  %s146_s8 = int_to_ptr.hbm [resolvable:$true] %s145_s8 }
  0x10   :  { %v84_v12 = vxor.u32 %v83_v10, %v82_v9  ;;  %s143_s5 = sshll.u32 %s282_s4, 4  ;;  %s283_s3 = smov [#allocation7]   ;;  %s144_s5 = int_to_ptr.vmem [resolvable:$true] %s143_s5 }
  0x11   :  { %v44_v3 = vmul.u32 128, %v38_v1  ;;  %s132_s9 = sshll.u32 %s283_s3, 4  ;;  %s134_s12 = sshll.u32 %s328_s2, 4  ;;  %s133_s9 = int_to_ptr.vmem [resolvable:$true] %s132_s9  ;;  %s135_s12 = int_to_ptr.hbm [resolvable:$true] %s134_s12 }
  0x12   :  { %v86_v17 = vxor.u32 %v85_v13, %v84_v12 }
  0x13   :  { %p161_p0 = scmp.le.s32.totalorder %s51_s0, 0  ;;  %p163_p1 = scmp.le.s32.totalorder %s51_s0, 1023  ;;  %v310_v6 = vadd.s32 %v44_v3, %v40_v2  ;;  %v74_v7 = vstv %s51_s0 }
  0x14   :  { %p162_p2 = scmp.le.s32.totalorder %s160_s23, 0  ;;  %p164_p3 = scmp.le.s32.totalorder %s160_s23, 1023  ;;  %v77_v8 = vstv %s160_s23  ;;  %v87_v23 = vand.u32 2147483647, %v86_v17 }
  0x15   :  { %s56_s1 = scalar_select %p161_p0, 1, 0  ;;  %vm75_vm0 = vcmp.ge.s32.totalorder %v310_v6, %v74_v7  ;;  %vm78_vm1 = vcmp.ge.s32.totalorder %v310_v6, %v77_v8  ;;  %vm120_vm4 = vcmp.lt.s32.totalorder %v310_v6, 50 }
  0x16   :  { %s58_s24 = scalar_select %p162_p2, 1, 0  ;;  %v76_v15 = vsel %vm75_vm0, 1, %v281_v14  ;;  %v79_v16 = vsel %vm78_vm1, 1, %v281_v14 }
  0x17   :  { %s61_s25 = scalar_select %p163_p1, 1, 0  ;;  %v80_v19 = vadd.s32 %v79_v16, %v76_v15 }
  0x18   :  { %s59_s26 = sadd.s32 %s58_s24, %s56_s1 }
  0x19   :  { %s63_s27 = scalar_select %p164_p3, 1, 0  ;;  %v69_v18 = vstv %s59_s26 }
  0x1b   :  { %s64_s28 = sadd.s32 %s63_s27, %s61_s25 }
  0x1c   :  { %p65_p4 = scmp.eq.s32.totalorder %s59_s26, %s64_s28  ;;  %p165_p5 = scmp.ne.s32.totalorder %s59_s26, %s64_s28 }
  0x1e   :  { %s167_s29 = scalar_select %p65_p4, 1, 0 }
  0x1f   :  { %s172_s30 = scalar_select %p165_p5, 1, 0 }
  0x20   :  { %v168_v20 = vstv %s167_s29 }
  0x21   :  { %vm169_vm2 = vcmp.ne.s32.totalorder %v168_v20, 0  ;;  %v173_v21 = vstv %s172_s30 }
  0x22   :  { %v170_v22 = vsel %vm169_vm2, %v69_v18, 0  ;;  %vm174_vm3 = vcmp.ne.s32.totalorder %v173_v21, 0 }
  0x23   :  { %v175_v24 = vsel %vm174_vm3, %v80_v19, %v170_v22 }
  0x24   :  { %v88_v25 = vmul.u32 40503, %v175_v24 }
  0x26   :  { %v89_v26 = vxor.u32 %v88_v25, %v87_v23 }
  0x28   :  { %v90_v27 = vand.u32 2147483647, %v89_v26 }
  0x2a   :  { %v92_v28 = vand.u32 65535, %v90_v27  ;;  %v93_v29 = vshrl.u32 %v90_v27, 16  ;;  %v125_v30 = vsel %vm120_vm4, %v90_v27, 2147483647 }
  0x2b   :  { %126 = vst [vmem:[#allocation8] sm:$0xff] %v125_v30 }
  0x2c   :  { %v95_v31 = vmul.u32 9362, %v92_v28  ;;  %v96_v32 = vmul.u32 37449, %v92_v28  ;;  %v97_v33 = vmul.u32 9362, %v93_v29  ;;  %148 = dma.vmem_to_hbm [thread:$0]  %s144_s5, 128, %s146_s8, [#allocation9]   ;;  %v98_v34 = vmul.u32 37449, %v93_v29 }
  0x2e   :  { %v99_v35 = vshll.u32 %v96_v32, 16  ;;  %v101_v36 = vshll.u32 %v97_v33, 16  ;;  %v100_v39 = vshrl.u32 %v96_v32, 16  ;;  %v102_v43 = vshrl.u32 %v97_v33, 16 }
  0x30   :  { %vm103_vm5 = vc.u32 %v95_v31, %v99_v35  ;;  %v105_v37 = vadd.s32 %v99_v35, %v95_v31 }
  0x31   :  { %v104_v38 = vsel %vm103_vm5, 1, %v281_v14 }
  0x32   :  { %v106_v40 = vadd.s32 %v104_v38, %v98_v34  ;;  %vm107_vm6 = vc.u32 %v105_v37, %v101_v36  ;;  %v109_v41 = vadd.s32 %v105_v37, %v101_v36 }
  0x33   :  { %v108_v42 = vsel %vm107_vm6, 1, %v281_v14 }
  0x34   :  { %v110_v44 = vadd.s32 %v108_v42, %v106_v40  ;;  %vm113_vm7 = vc.u32 %v109_v41, 2454267026 }
  0x35   :  { %v114_v46 = vsel %vm113_vm7, 1, %v281_v14 }
  0x36   :  { %v111_v45 = vadd.s32 %v110_v44, %v100_v39 }
  0x38   :  { %v112_v47 = vadd.s32 %v111_v45, %v102_v43 }
  0x3a   :  { %v115_v48 = vadd.s32 %v114_v46, %v112_v47 }
  0x3c   :  { %v116_v49 = vshrl.u32 %v115_v48, 2 }
  0x3e   :  { %v117_v50 = vmul.u32 7, %v116_v49 }
  0x40   :  { %v118_v51 = vsub.s32 %v90_v27, %v117_v50 }
  0x42   :  { %v121_v52 = vsel %vm120_vm4, %v118_v51, 7 }
  0x43   :  { %v122_v53 = vshll.u32 %v121_v52, 10 }
  0x45   :  { %v123_v54 = vor.u32 %v122_v53, %v310_v6 }
  0x47   :  { %124 = vst [vmem:[#allocation7] sm:$0xff] %v123_v54 }
  0x48   :  { %137 = dma.vmem_to_hbm [thread:$0]  %s133_s9, 128, %s135_s12, [#allocation6]  }
  0x49   :  { %273 = dma.done.wait [#allocation6], 128  }
  0x4a   :  { %274 = vsyncadd [#allocation6], 4294967168 }
  0x4b   :  { %275 = dma.done.wait [#allocation9], 128  }
  0x4c   :  { %276 = vsyncadd [#allocation9], 4294967168 }
  0x4d   :  { %157 = vsyncpa [#allocation5], 1 }
  0x4e   :  { %158 = vsyncpa [#allocation6], 1 }
  0x4f   :  { %159 = vsyncpa [#allocation9], 1 }

</bundles_post_ra>
